<compile_context>
chip_gen: v6e
topology: v6e:2x2x1
jax: 0.10.0
libtpu: 0.0.40
codegen_flags: <defaults>
</compile_context>

<pallas_src>
import jax
import jax.numpy as jnp
from jax import lax
from jax.experimental import pallas as pl
from jax.experimental.pallas import tpu as pltpu


# Contract the last dim of both operands ("NT" form).
_NT_DIMS = (((1,), (1,)), ((), ()))


def _mlp_kernel(x_ref, w1_ref, b1w2_ref, b2_ref, out_ref):
    # x_ref   : (tb, D) input dtype (f32/bf16) -- cast to bf16 in-kernel.
    # w1_ref  : (H, D)  bf16 (PyTorch Linear layout), resident.
    # b1w2_ref: (H, 2)  f32  -- [:, 0] = b1, [:, 1] = w2 column, resident.
    # b2_ref  : (1, 1)  f32  (SMEM scalar).
    # out_ref : (1, tb) f32  (lane-dense).
    xb = x_ref[...].astype(jnp.bfloat16)
    w1 = w1_ref[...].astype(jnp.bfloat16)
    # Layer 1 on the MXU, transposed so the batch sits on the lane axis.
    ht = lax.dot_general(w1, xb, _NT_DIMS,
                         preferred_element_type=jnp.float32)        # (H, tb)
    bw = b1w2_ref[...]
    ht = jnp.maximum(ht + bw[:, 0:1], 0.0)                          # bias + ReLU (VPU)
    # Layer 2: VPU multiply + sublane reduce -> already lane-major (1, tb).
    y = jnp.sum(ht * bw[:, 1:2], axis=0, keepdims=True)
    out_ref[...] = y + b2_ref[0, 0]


def _linear_kernel(x_ref, w_ref, b_ref, out_ref):
    # use_hidden=False path: y = x @ w.T + b, computed transposed -> (1, tb).
    xb = x_ref[...].astype(jnp.bfloat16)
    w = w_ref[...].astype(jnp.bfloat16)
    y = lax.dot_general(w, xb, _NT_DIMS, preferred_element_type=jnp.float32)
    out_ref[...] = y + b_ref[0, 0]


def _round_up(x, m):
    return (x + m - 1) // m * m


def _vmem_usable_bytes():
    """Conservative per-kernel VMEM budget for the current TPU generation."""
    cap = 128 << 20
    try:
        cap = int(pltpu.get_tpu_info().vmem_capacity_bytes)
    except Exception:  # interpret mode / attribute differences
        pass
    # Half of physical, capped at 64 MiB (v5e/v6e -> 64 MiB, v7x -> 32 MiB).
    return min(cap // 2, 64 << 20)


def _pick_batch_tile(batch, feat_in, hidden, x_itemsize, budget, requested=None):
    if requested is not None:
        tile = max(128, (int(requested) // 128) * 128)
    else:
        # Size the x block by bytes (~1 MiB target; per-grid-step overhead is
        # ~0.35 us), rows in [128, 8192]; never wider than the 128-rounded batch.
        target_rows = max(128, (1 << 20) // max(1, feat_in * x_itemsize))
        tile = 128
        while tile * 2 <= target_rows and tile < 8192:
            tile *= 2
        tile = min(tile, max(128, pl.next_power_of_2(batch)))
    # Whole-footprint VMEM accounting: W1 (1 buffer, Buffered(1)), fused bias
    # (1 buffer, lane-padded), x (2 buffers), f32 (H, tile) intermediate,
    # (1, tile) f32 output (sublane-padded, 2 buffers).
    fixed = hidden * feat_in * 2 + _round_up(hidden, 8) * 128 * 4

    def fits(t):
        per_tile = (2 * t * feat_in * x_itemsize    # x double buffer
                    + hidden * t * 4                # (H, t) f32 intermediate
                    + 2 * 8 * t * 4)                # output buffers
        return fixed + per_tile <= budget

    while tile > 128 and not fits(tile):
        tile //= 2
    # Prefer >= 2 grid steps so the "parallel" batch axis can shard across
    # v7x's two TensorCores instead of leaving one idle.
    while tile > 128 and pl.cdiv(batch, tile) < 2:
        tile //= 2
    return tile


def hn_score_predictor(x, params, *, batch_tile=None):
    """Pallas forward of HNScorePredictor. Returns shape (batch,), i.e. squeeze(-1)."""
    B, D = x.shape
    use_hidden = "w1" in params
    H = params["w1"].shape[0] if use_hidden else 1

    usable = _vmem_usable_bytes()
    tile = _pick_batch_tile(B, D, H, x.dtype.itemsize, (usable * 3) // 4, batch_tile)
    g = pl.cdiv(B, tile)

    x_spec = pl.BlockSpec((tile, D), lambda i: (i, 0))
    out_spec = pl.BlockSpec((1, tile), lambda i: (0, i))      # lane-dense output
    resident = lambda i: (0, 0)

    out_shape = jax.ShapeDtypeStruct((1, B), jnp.float32)
    cparams = pltpu.CompilerParams(
        dimension_semantics=("parallel",),
        vmem_limit_bytes=int(usable))

    if use_hidden:
        w1, b1w2, b2 = params["w1"], params["b1w2"], params["b2"]
        cost = pl.CostEstimate(
            flops=2 * B * D * H + 3 * B * H,
            transcendentals=0,
            bytes_accessed=(B * D * x.dtype.itemsize
                            + H * D * w1.dtype.itemsize + H * 8 + B * 4))
        out = pl.pallas_call(
            _mlp_kernel,
            out_shape=out_shape,
            grid_spec=pltpu.PrefetchScalarGridSpec(
                num_scalar_prefetch=0,
                grid=(g,),
                in_specs=[
                    x_spec,
                    # Resident weights: single-buffered (constant index_map).
                    pl.BlockSpec((H, D), resident, pipeline_mode=pl.Buffered(1)),
                    pl.BlockSpec((H, 2), resident, pipeline_mode=pl.Buffered(1)),
                    pl.BlockSpec(memory_space=pltpu.MemorySpace.SMEM),   # b2 scalar
                ],
                out_specs=out_spec),
            compiler_params=cparams,
            cost_estimate=cost,
        )(x, w1, b1w2, b2)
    else:
        w, b = params["w"], params["b"]
        cost = pl.CostEstimate(
            flops=2 * B * D,
            transcendentals=0,
            bytes_accessed=B * D * x.dtype.itemsize + D * w.dtype.itemsize + B * 4)
        out = pl.pallas_call(
            _linear_kernel,
            out_shape=out_shape,
            grid_spec=pltpu.PrefetchScalarGridSpec(
                num_scalar_prefetch=0,
                grid=(g,),
                in_specs=[
                    x_spec,
                    pl.BlockSpec((1, D), resident, pipeline_mode=pl.Buffered(1)),
                    pl.BlockSpec(memory_space=pltpu.MemorySpace.SMEM),
                ],
                out_specs=out_spec),
            compiler_params=cparams,
            cost_estimate=cost,
        )(x, w, b)

    # (1, B) -> (B,): implements squeeze(-1).  Ragged-edge columns computed
    # from out-of-bounds x rows are never written back by Pallas.
    return out[0]


def init_params(key, input_dim, hidden_dim=None):
    """Deterministic synthetic params, stored in kernel-ready layout."""
    if hidden_dim:
        k1, k2, k3, k4 = jax.random.split(key, 4)
        lim1 = 1.0 / float(input_dim) ** 0.5
        lim2 = 1.0 / float(hidden_dim) ** 0.5
        w1 = jax.random.uniform(k1, (hidden_dim, input_dim), jnp.float32, -lim1, lim1)
        b1 = jax.random.uniform(k2, (hidden_dim,), jnp.float32, -lim1, lim1)
        w2 = jax.random.uniform(k3, (hidden_dim,), jnp.float32, -lim2, lim2)
        b2 = jax.random.uniform(k4, (1, 1), jnp.float32, -lim2, lim2)
        return {
            "w1": w1.astype(jnp.bfloat16),            # PyTorch (out, in) layout, bf16 once
            "b1w2": jnp.stack([b1, w2], axis=1),      # (H, 2) f32: [:,0]=b1, [:,1]=w2
            "b2": b2,                                  # (1, 1) f32
        }
    k1, k2 = jax.random.split(key)
    lim = 1.0 / float(input_dim) ** 0.5
    return {
        "w": jax.random.uniform(k1, (1, input_dim), jnp.float32, -lim, lim).astype(jnp.bfloat16),
        "b": jax.random.uniform(k2, (1, 1), jnp.float32, -lim, lim),
    }


if __name__ == "__main__":
    batch, input_dim, hidden_dim = 16, 32, 32

    key = jax.random.PRNGKey(0)
    kx, kp, kl = jax.random.split(key, 3)
    x = jax.random.normal(kx, (batch, input_dim), jnp.float32)

    # --- hidden-layer (MLP) path ---
    params = init_params(kp, input_dim, hidden_dim)
    y = jax.block_until_ready(hn_score_predictor(x, params))
    assert y.shape == (batch,)

    # Pure-JAX reference with the same bf16 rounding the kernel applies.
    xb = x.astype(jnp.bfloat16).astype(jnp.float32)
    w1f = params["w1"].astype(jnp.float32)
    b1 = params["b1w2"][:, 0]
    w2 = params["b1w2"][:, 1]
    h_ref = jnp.maximum(xb @ w1f.T + b1, 0.0)
    y_ref = h_ref @ w2 + params["b2"][0, 0]
    assert jnp.allclose(y, y_ref, atol=2e-3, rtol=2e-3), float(jnp.max(jnp.abs(y - y_ref)))

    # --- no-hidden (single Linear) path ---
    params_lin = init_params(kl, input_dim, None)
    y2 = jax.block_until_ready(hn_score_predictor(x, params_lin))
    wf = params_lin["w"].astype(jnp.float32)
    y2_ref = xb @ wf[0, :] + params_lin["b"][0, 0]
    assert y2.shape == (batch,)
    assert jnp.allclose(y2, y2_ref, atol=2e-3, rtol=2e-3), float(jnp.max(jnp.abs(y2 - y2_ref)))

    print("KERNEL_OK")
</pallas_src>

<mosaic_0001>
module attributes {stable_mosaic.version = 11 : i64} {
  func.func @_mlp_kernel(%arg0: i32, %arg1: memref<128x32xf32, #tpu.memory_space<vmem>>, %arg2: memref<32x32xbf16, #tpu.memory_space<vmem>>, %arg3: memref<32x2xf32, #tpu.memory_space<vmem>>, %arg4: memref<1x1xf32, #tpu.memory_space<smem>>, %arg5: memref<1x128xf32, #tpu.memory_space<vmem>>) attributes {dimension_semantics = [#tpu.dimension_semantics<parallel>], iteration_bounds = array<i64: 1>, scalar_prefetch = 0 : i64, scratch_operands = 0 : i64, tpu.core_type = #tpu.core_type<tc>, window_params = [{transform_indices = @transform_0, window_bounds = array<i64: 128, 32>}, {pipeline_mode = #tpu.pipeline_mode<synchronous>, transform_indices = @transform_1, window_bounds = array<i64: 32, 32>}, {pipeline_mode = #tpu.pipeline_mode<synchronous>, transform_indices = @transform_2, window_bounds = array<i64: 32, 2>}, {transform_indices = @transform_3, window_bounds = array<i64: 1, 1>}, {transform_indices = @transform_4, window_bounds = array<i64: 1, 128>}]} {
    %c0 = arith.constant 0 : index
    %c0_0 = arith.constant 0 : index
    %0 = vector.load %arg1[%c0, %c0_0] : memref<128x32xf32, #tpu.memory_space<vmem>>, vector<128x32xf32>
    %1 = arith.truncf %0 : vector<128x32xf32> to vector<128x32xbf16>
    %c0_1 = arith.constant 0 : index
    %c0_2 = arith.constant 0 : index
    %2 = vector.load %arg2[%c0_1, %c0_2] : memref<32x32xbf16, #tpu.memory_space<vmem>>, vector<32x32xbf16>
    %cst = arith.constant dense<0.000000e+00> : vector<32x128xf32>
    %3 = tpu.matmul %2, %1, %cst {dimension_numbers = #tpu.dot_dimension_numbers<[1], [1], [0], [0], [0, 0, 1, 0], [], []>} : vector<32x32xbf16>, vector<128x32xbf16>, vector<32x128xf32> -> vector<32x128xf32>
    %c0_3 = arith.constant 0 : index
    %c0_4 = arith.constant 0 : index
    %4 = vector.load %arg3[%c0_3, %c0_4] : memref<32x2xf32, #tpu.memory_space<vmem>>, vector<32x2xf32>
    %5 = vector.extract_strided_slice %4 {offsets = [0, 0], sizes = [32, 1], strides = [1, 1]} : vector<32x2xf32> to vector<32x1xf32>
    %6 = vector.broadcast %5 : vector<32x1xf32> to vector<32x128xf32>
    %7 = arith.addf %3, %6 : vector<32x128xf32>
    %cst_5 = arith.constant 0.000000e+00 : f32
    %8 = vector.broadcast %cst_5 : f32 to vector<32x128xf32>
    %9 = arith.maximumf %7, %8 : vector<32x128xf32>
    %10 = vector.extract_strided_slice %4 {offsets = [0, 1], sizes = [32, 1], strides = [1, 1]} : vector<32x2xf32> to vector<32x1xf32>
    %11 = vector.broadcast %10 : vector<32x1xf32> to vector<32x128xf32>
    %12 = arith.mulf %9, %11 : vector<32x128xf32>
    %cst_6 = arith.constant dense<0.000000e+00> : vector<128xf32>
    %13 = vector.multi_reduction <add>, %12, %cst_6 [0] : vector<32x128xf32> to vector<128xf32>
    %14 = vector.shape_cast %13 : vector<128xf32> to vector<1x128xf32>
    %c0_7 = arith.constant 0 : index
    %c0_8 = arith.constant 0 : index
    %15 = memref.load %arg4[%c0_7, %c0_8] : memref<1x1xf32, #tpu.memory_space<smem>>
    %16 = vector.broadcast %15 : f32 to vector<1x128xf32>
    %17 = arith.addf %14, %16 : vector<1x128xf32>
    %c0_9 = arith.constant 0 : index
    %c0_10 = arith.constant 0 : index
    %18 = vector.load %arg5[%c0_9, %c0_10] : memref<1x128xf32, #tpu.memory_space<vmem>>, vector<1x128xf32>
    tpu.vector_store %arg5[%c0_9, %c0_10], %17 {strides = array<i32>} : memref<1x128xf32, #tpu.memory_space<vmem>>, vector<1x128xf32>,
    return
  }
  func.func @transform_0(%arg0: i32) -> (i32, i32) {
    %c0_i32 = arith.constant 0 : i32
    %c0_i32_0 = arith.constant 0 : i32
    return %arg0, %c0_i32 : i32, i32
  }
  func.func @transform_1(%arg0: i32) -> (i32, i32) {
    %c0_i32 = arith.constant 0 : i32
    %c0_i32_0 = arith.constant 0 : i32
    %c0_i32_1 = arith.constant 0 : i32
    return %c0_i32, %c0_i32_0 : i32, i32
  }
  func.func @transform_2(%arg0: i32) -> (i32, i32) {
    %c0_i32 = arith.constant 0 : i32
    %c0_i32_0 = arith.constant 0 : i32
    %c0_i32_1 = arith.constant 0 : i32
    return %c0_i32, %c0_i32_0 : i32, i32
  }
  func.func @transform_3(%arg0: i32) -> (i32, i32) {
    %c0_i32 = arith.constant 0 : i32
    %c0_i32_0 = arith.constant 0 : i32
    %c0_i32_1 = arith.constant 0 : i32
    return %c0_i32, %c0_i32_0 : i32, i32
  }
  func.func @transform_4(%arg0: i32) -> (i32, i32) {
    %c0_i32 = arith.constant 0 : i32
    %c0_i32_0 = arith.constant 0 : i32
    return %c0_i32, %arg0 : i32, i32
  }
}

</mosaic_0001>

<bundles_post_ra>
// kernel: tpu_custom_call.1
= control target key start
LH: loop header
LB: loop body
LE: loop exit
PB: predicated region body
PF: predicated region fallthrough
CT: control target
= control target key end

     0   :  { %vm82_vm0 = vcmask 261120   ;;  %v286_v5 = vmov 0   ;;  %s404_s0 = inlined_call_operand.vmem [shape: f32[16,32], index: 0, kind: input, shape index: {}]   ;;  %s405_s1 = inlined_call_operand.vmem [shape: bf16[32,32], index: 1, kind: input, shape index: {}]   ;;  %s406_s2 = inlined_call_operand.vmem [shape: f32[32,2], index: 2, kind: input, shape index: {}]   ;;  %s407_s3 = inlined_call_operand.<no memory space> [shape: f32[1,1], index: 3, kind: input, shape index: {}]   ;;  %s408_s4 = inlined_call_operand.hbm [shape: f32[1,16], index: 4, kind: output, shape index: {}]  }
   0x1   :  { %v34_v0 = vld [vmem:[%s404_s0 + $0x70] sm:$0xff]  ;;  %v35_v1 = vld [vmem:[%s404_s0 + $0x78] sm:$0xff]  ;;  %v32_v2 = vld [vmem:[%s404_s0 + $0x60] sm:$0xff]  ;;  %259 = vset.pattern.permute.xlu1 %v286_v5  ;;  %258 = vset.pattern.permute.xlu0 %v286_v5 }
   0x2   :  { %v43_v3 = vpack.c.bf16 %v35_v1, %v34_v0  ;;  %v33_v4 = vld [vmem:[%s404_s0 + $0x68] sm:$0xff]  ;;  %v30_v8 = vld [vmem:[%s404_s0 + $0x50] sm:$0xff]  ;;  %v31_v9 = vld [vmem:[%s404_s0 + $0x58] sm:$0xff] }
   0x3   :  { %v42_v6 = vpack.c.bf16 %v33_v4, %v32_v2  ;;  %v262_v10 = vld [vmem:[%s405_s1] sm:$0xff]   ;;  %v50_v11 = vld [vmem:[%s406_s2 + $0x10] sm:$0xff] }
   0x4   :  { %247 = vmatprep.subr.msk.bf16.mxu0 %vm82_vm0, %v43_v3  ;;  %v111_v7 = vsel %vm82_vm0, %v43_v3, 0  ;;  %243 = vmatprep.mubr.msk.bf16.mxu0 %vm82_vm0, %v262_v10  ;;  %v48_v12 = vld [vmem:[%s406_s2] sm:$0xff] }
   0x5   :  { %228 = vmatpush3.bf16.xpose.msra.mxu0 %v111_v7  ;;  %64 = vperm.xlu1 %259, %v50_v11  }
   0x6   :  { %248 = vmatprep.subr.msk.bf16.mxu0 %vm82_vm0, %v42_v6 }
   0x7   :  { %10 = vsyncpa [#allocation4], 0  ;;  %v108_v13 = vsel %vm82_vm0, %v42_v6, 0  ;;  %v41_v14 = vpack.c.bf16 %v31_v9, %v30_v8  ;;  %v51_v15 = vld [vmem:[%s406_s2 + $0x18] sm:$0xff]  ;;  %54 = vperm.xlu0 %258, %v48_v12   ;;  %v49_v16 = vld [vmem:[%s406_s2 + $0x8] sm:$0xff]  ;;  %v287_v19 = vmov 1   ;;  %v196_v8 = vstv %s407_s3 }
   0x8   :  { %v28_v17 = vld [vmem:[%s404_s0 + $0x40] sm:$0xff]  ;;  %v29_v18 = vld [vmem:[%s404_s0 + $0x48] sm:$0xff]  ;;  %v26_v22 = vld [vmem:[%s404_s0 + $0x30] sm:$0xff]  ;;  %s288_s6 = smov [#allocation3]  }
   0x9   :  { %69 = vperm.xlu1 %259, %v51_v15   ;;  %v105_v20 = vsel %vm82_vm0, %v41_v14, 0  ;;  %v40_v21 = vpack.c.bf16 %v29_v18, %v28_v17  ;;  %v27_v23 = vld [vmem:[%s404_s0 + $0x38] sm:$0xff]  ;;  %v24_v26 = vld [vmem:[%s404_s0 + $0x20] sm:$0xff]  ;;  %v25_v27 = vld [vmem:[%s404_s0 + $0x28] sm:$0xff]  ;;  %s205_s7 = sshll.u32 %s288_s6, 4  ;;  %s206_s7 = int_to_ptr.vmem [resolvable:$true] %s205_s7 }
   0xa   :  { %v39_v25 = vpack.c.bf16 %v27_v23, %v26_v22  ;;  %v38_v29 = vpack.c.bf16 %v25_v27, %v24_v26  ;;  %v22_v30 = vld [vmem:[%s404_s0 + $0x10] sm:$0xff]  ;;  %v23_v31 = vld [vmem:[%s404_s0 + $0x18] sm:$0xff]  ;;  %v20_v34 = vld [vmem:[%s404_s0] sm:$0xff]  ;;  %s264_s8 = scalar_lea.vmem %s206_s7, 16  ;;  %s268_s9 = scalar_lea.vmem %s206_s7, 32 }
   0xb   :  { %59 = vperm.xlu0 %258, %v49_v16   ;;  %v102_v24 = vsel %vm82_vm0, %v40_v21, 0  ;;  %v37_v33 = vpack.c.bf16 %v23_v31, %v22_v30  ;;  %v21_v35 = vld [vmem:[%s404_s0 + $0x8] sm:$0xff]  ;;  %p265_p0 = scmp.ne.s32.totalorder %s206_s7, %s264_s8  ;;  %p269_p1 = scmp.lt.s32.totalorder %s206_s7, %s206_s7 }
   0xc   :  { %v99_v28 = vsel %vm82_vm0, %v39_v25, 0  ;;  %v96_v32 = vsel %vm82_vm0, %v38_v29, 0  ;;  %v36_v37 = vpack.c.bf16 %v21_v35, %v20_v34  ;;  %v263_v39 = vld [vmem:[%s405_s1 + $0x8] sm:$0xff]   ;;  %p270_p2 = scmp.lt.s32.totalorder %s268_s9, %s264_s8 }
   0xd   :  { %230 = vmatpush3.bf16.xpose.msra.mxu0 %v108_v13  ;;  %261 = vset.pattern.permute.xlu1 %v287_v19  ;;  %v93_v36 = vsel %vm82_vm0, %v37_v33, 0 }
   0xe   :  { %249 = vmatprep.subr.msk.bf16.mxu0 %vm82_vm0, %v41_v14  ;;  %171 = vperm.xlu1 %261, %v49_v16   ;;  %v90_v38 = vsel %vm82_vm0, %v36_v37, 0  ;;  %p271_p3 = por %p270_p2, %p269_p1 }
   0xf   :  { %260 = vset.pattern.permute.xlu0 %v287_v19 }
  0x10   :  { %167 = vperm.xlu0 %260, %v48_v12   ;;  %p272_p4 = pnand %p271_p3, %p265_p0 }
  0x12   :  { %175 = vperm.xlu1 %261, %v50_v11  }
  0x14   :  { %179 = vperm.xlu0 %260, %v51_v15  }
  0x15   :  { %232 = vmatpush3.bf16.xpose.msra.mxu0 %v105_v20 }
  0x16   :  { %250 = vmatprep.subr.msk.bf16.mxu0 %vm82_vm0, %v40_v21 }
  0x1d   :  { %234 = vmatpush3.bf16.xpose.msra.mxu0 %v102_v24 }
  0x1e   :  { %251 = vmatprep.subr.msk.bf16.mxu0 %vm82_vm0, %v39_v25 }
  0x25   :  { %236 = vmatpush3.bf16.xpose.msra.mxu0 %v99_v28 }
  0x26   :  { %252 = vmatprep.subr.msk.bf16.mxu0 %vm82_vm0, %v38_v29 }
  0x2d   :  { %238 = vmatpush3.bf16.xpose.msra.mxu0 %v96_v32 }
  0x2e   :  { %253 = vmatprep.subr.msk.bf16.mxu0 %vm82_vm0, %v37_v33 }
  0x35   :  { %240 = vmatpush3.bf16.xpose.msra.mxu0 %v93_v36 }
  0x36   :  { %254 = vmatprep.subr.msk.bf16.mxu0 %vm82_vm0, %v36_v37 }
  0x3d   :  { %242 = vmatpush3.bf16.xpose.msra.mxu0 %v90_v38 }
  0x44   :  { %244 = vmatmul.mubr.msk.bf16.vlgmr.msra.gmra.mxu0 %vm82_vm0, %v263_v39 }
  0x80   :  { %v65_v40 = vpop.permute.xlu1 %64 }
  0x82   :  { %v55_v41 = vpop.permute.xlu0 %54 }
  0x84   :  { %v70_v42 = vpop.permute.xlu1 %69 }
  0x86   :  { %v60_v43 = vpop.permute.xlu0 %59 }
  0x89   :  { %v172_v47 = vpop.permute.xlu1 %171 }
  0x8b   :  { %v168_v50 = vpop.permute.xlu0 %167 }
  0x8d   :  { %v176_v57 = vpop.permute.xlu1 %175 }
  0x8f   :  { %v180_v61 = vpop.permute.xlu0 %179 }
 0x104   :  { %v245_v44 = vpop.f32.mrf.mxu0 }
 0x105   :  { %v156_v49 = vadd.f32 %v245_v44, %v65_v40 }
 0x106   :  { %v147_v45 = vpop.f32.mrf.mxu0 }
 0x107   :  { %v148_v46 = vadd.f32 %v147_v45, %v55_v41  ;;  %v164_v55 = vmax.f32 %v156_v49, 0.0 }
 0x108   :  { %v246_v48 = vpop.f32.mrf.mxu0 }
 0x109   :  { %v162_v52 = vmax.f32 %v148_v46, 0.0  ;;  %v159_v53 = vadd.f32 %v246_v48, %v70_v42  ;;  %v184_v62 = vmul.f32 %v176_v57, %v164_v55 }
 0x10a   :  { %v150_v51 = vpop.f32.mrf.mxu0 }
 0x10b   :  { %v151_v54 = vadd.f32 %v150_v51, %v60_v43  ;;  %v182_v58 = vmul.f32 %v168_v50, %v162_v52  ;;  %v165_v59 = vmax.f32 %v159_v53, 0.0 }
 0x10d   :  { %v163_v56 = vmax.f32 %v151_v54, 0.0  ;;  %v185_v0 = vmul.f32 %v180_v61, %v165_v59 }
 0x10f   :  { %v183_v60 = vmul.f32 %v172_v47, %v163_v56 }
 0x111   :  { %v186_v63 = vadd.f32 %v183_v60, %v182_v58 }
 0x113   :  { %v187_v1 = vadd.f32 %v186_v63, %v184_v62 }
 0x115   :  { %v188_v2 = vadd.f32 %v187_v1, %v185_v0 }
 0x117   :  { %v189_v3 = vrot.slane %v188_v2, 4 }
 0x119   :  { %v190_v4 = vadd.f32 %v189_v3, %v188_v2 }
 0x11b   :  { %v191_v5 = vrot.slane %v190_v4, 2 }
 0x11d   :  { %v192_v6 = vadd.f32 %v191_v5, %v190_v4 }
 0x11f   :  { %v193_v7 = vrot.slane %v192_v6, 1 }
 0x121   :  { %v194_v9 = vadd.f32 %v193_v7, %v192_v6 }
 0x123   :  { %v197_v10 = vadd.f32 %v196_v8, %v194_v9 }
 0x125   :  { %198 = vst [vmem:[#allocation3] sm:$0x1] %v197_v10 }
 0x126   :  { %275 = shalt.err (!%p272_p4)
}
 0x127   :  { %208 = dma.vmem_to_hbm [thread:$0]  %s206_s7, 16, %s408_s4, [#allocation4]  }
 0x128   :  { %284 = dma.done.wait [#allocation4], 16  }
 0x129   :  { %285 = vsyncadd [#allocation4], 4294967280 }
 0x12a   :  { %212 = vsyncpa [#allocation4], 1 }

</bundles_post_ra>
